<compile_context>
chip_gen: v7x
topology: tpu7x:2x2x1
jax: 0.10.0
libtpu: 0.0.40
codegen_flags: <defaults>
</compile_context>

<pallas_src>
import functools

import jax
import jax.numpy as jnp
from jax.experimental import pallas as pl
from jax.experimental.pallas import tpu as pltpu

INV_SQRT2 = 0.7071067811865476
LN_EPS = 1e-5  # PyTorch nn.LayerNorm default


def _gelu_exact(x):
    # nn.GELU() default = exact (erf-based) GELU
    return 0.5 * x * (1.0 + jax.lax.erf(x * INV_SQRT2))


def dwtnet_kernel(aux_ref,   # VMEM (6, 2F): [fc_b|0], [c2|c2], [ln_g|0], [ln_b|0], [w0..|0], [w1..|0]
                  xp_ref,    # VMEM (TM, 2F): packed rows [x[2k] | x[2k+1]]
                  w1_ref,    # VMEM (F, F): fc weight transposed (in x out)
                  w2_ref,    # VMEM (F, NOUT): W_cat = [w0*W | w1*W] if fused, else W
                  op_ref):   # VMEM (TM, 2F): packed output [even | odd]
    F = w1_ref.shape[0]
    fused = w2_ref.shape[1] == 2 * F   # static (decided at trace time)

    xe = xp_ref[:, :F]
    xo = xp_ref[:, F:]

    # haar DWT along the sequence axis (pywt convention, even length):
    #   cA[k] = (x[2k] + x[2k+1]) / sqrt(2),  cD[k] = (x[2k] - x[2k+1]) / sqrt(2)
    cA = (xe + xo) * INV_SQRT2
    cD = (xe - xo) * INV_SQRT2

    # fc(cA) = Dropout(GELU(Linear(cA)))  -- dropout is identity in eval mode
    w1 = w1_ref[...]
    h = _gelu_exact(
        jnp.dot(cA.astype(w1.dtype), w1, preferred_element_type=jnp.float32)
        + aux_ref[0:1, :F])

    # LayerNorm(h + cD) over features: two-pass (centered) variance, gamma folded
    u = h + cD
    m = jnp.mean(u, axis=-1, keepdims=True)
    uc = u - m
    var = jnp.mean(uc * uc, axis=-1, keepdims=True)
    scale = aux_ref[2:3, :F] * jax.lax.rsqrt(var + LN_EPS)
    y = uc * scale + aux_ref[3:4, :F]

    # ConvTranspose1d(in=1, out=1, k=2, stride=2) + second fc
    w2 = w2_ref[...]
    yW = jnp.dot(y.astype(w2.dtype), w2, preferred_element_type=jnp.float32)
    if fused:
        # w0/w1 folded into W_cat columns -> one lane-dense full-width store
        op_ref[...] = _gelu_exact(yW + aux_ref[1:2, :])
    else:
        c2 = aux_ref[1:2, :F]
        op_ref[:, :F] = _gelu_exact(aux_ref[4:5, :F] * yW + c2)   # even positions
        op_ref[:, F:] = _gelu_exact(aux_ref[5:6, :F] * yW + c2)   # odd positions


def _round_up(n, m):
    return ((n + m - 1) // m) * m


@functools.partial(jax.jit, static_argnames=("tile_bytes", "tm_max"))
def dwtnet_forward(x, params, *, tile_bytes=2 << 20, tm_max=8192):
    """x: (1, L, F) float32, L even. Returns (1, L, F) float32."""
    B, L, F = x.shape
    assert B == 1, "reference ConvTranspose1d(in_channels=1) requires batch size 1"
    assert L % 2 == 0, "even seq_len required by the packed even/odd layout"
    L2 = L // 2
    F2 = 2 * F

    # pack even/odd sequence positions into one lane-dense slab (free reshape)
    xp = x[0].reshape(L2, F2)

    # --- tile sizing: ~tile_bytes per I/O tile; >= 2 grid steps when L2 > 8
    # (so the "parallel" grid axis can use both v7x TensorCores); ragged last
    # block handled by Pallas (no wrapper pad / output slice).
    row_bytes = F2 * 4
    tm_cap = max(8, min(tm_max, (tile_bytes // row_bytes) // 8 * 8))
    if L2 <= 8:
        TM = L2                                        # full-dim (partial sublane) tile
    else:
        TM = min(_round_up((L2 + 1) // 2, 8), tm_cap)  # >= 2 grid steps
    grid = (pl.cdiv(L2, TM),)

    # --- parameter prep (all tiny; runs once per call under jit)
    w0 = params["conv_w"][0, 0, 0]
    w1 = params["conv_w"][0, 0, 1]
    cb = params["conv_b"][0]

    wfc_t = params["fc_w"].T.astype(jnp.float32)              # (F_in, F_out)
    # folded bias for the post-transconv fc:  conv_b * colsum(W.T) + fc_b
    c2 = cb * jnp.sum(wfc_t, axis=0) + params["fc_b"]

    fused = F <= 64          # wider-N fusion only while one MXU pass still covers it
    w2 = jnp.concatenate([w0 * wfc_t, w1 * wfc_t], axis=1) if fused else wfc_t
    NOUT = w2.shape[1]

    # bf16 operands once the matmuls matter (large F); f32 at small (HBM-bound) F
    wdt = jnp.bfloat16 if F >= 256 else jnp.float32
    wbytes = 2 if F >= 256 else 4

    zf = jnp.zeros((F,), jnp.float32)
    aux = jnp.stack([
        jnp.concatenate([params["fc_b"].astype(jnp.float32), zf]),   # row 0: fc bias
        jnp.concatenate([c2, c2]).astype(jnp.float32),               # row 1: c_cat
        jnp.concatenate([params["ln_g"].astype(jnp.float32), zf]),   # row 2: LN gamma
        jnp.concatenate([params["ln_b"].astype(jnp.float32), zf]),   # row 3: LN beta
        jnp.concatenate([jnp.full((F,), w0, jnp.float32), zf]),      # row 4: conv w0 (unfused path)
        jnp.concatenate([jnp.full((F,), w1, jnp.float32), zf]),      # row 5: conv w1 (unfused path)
    ])

    io_spec = pl.BlockSpec((TM, F2), lambda i: (i, 0))
    aux_spec = pl.BlockSpec((6, F2), lambda i: (0, 0))      # resident across iterations
    w1_spec = pl.BlockSpec((F, F), lambda i: (0, 0))
    w2_spec = pl.BlockSpec((F, NOUT), lambda i: (0, 0))

    cost = pl.CostEstimate(
        flops=2 * L2 * F * (F + NOUT) + 30 * L2 * F,
        transcendentals=3 * L2 * F,
        bytes_accessed=4 * (2 * L2 * F2 + 6 * F2) + wbytes * F * (F + NOUT),
    )

    out_packed = pl.pallas_call(
        dwtnet_kernel,
        out_shape=jax.ShapeDtypeStruct((L2, F2), jnp.float32),
        grid=grid,
        in_specs=[aux_spec, io_spec, w1_spec, w2_spec],
        out_specs=io_spec,
        compiler_params=pltpu.CompilerParams(
            dimension_semantics=("parallel",)),
        cost_estimate=cost,
    )(aux, xp, wfc_t.astype(wdt), w2.astype(wdt))

    # packed rows [even | odd] -> (L, F) is a free reshape (no slicing)
    return out_packed.reshape(L, F)[None]


def ref_forward(x, p):
    """Pure-JAX reference of the PyTorch forward (eval mode), for a sanity check."""
    B, L, F = x.shape
    xe = x[:, 0::2, :]
    xo = x[:, 1::2, :]
    cA = (xe + xo) * INV_SQRT2
    cD = (xe - xo) * INV_SQRT2
    h = _gelu_exact(cA @ p["fc_w"].T + p["fc_b"])
    u = h + cD
    mean = u.mean(-1, keepdims=True)
    var = ((u - mean) ** 2).mean(-1, keepdims=True)
    y = (u - mean) / jnp.sqrt(var + LN_EPS) * p["ln_g"] + p["ln_b"]
    w0 = p["conv_w"][0, 0, 0]
    w1 = p["conv_w"][0, 0, 1]
    cb = p["conv_b"][0]
    z = jnp.stack([y * w0 + cb, y * w1 + cb], axis=2).reshape(B, L, F)
    return _gelu_exact(z @ p["fc_w"].T + p["fc_b"])


def init_params(key, num_feature):
    k1, k2, k3, k4 = jax.random.split(key, 4)
    bound = 1.0 / jnp.sqrt(num_feature)
    return {
        # nn.Linear(num_feature, num_feature): weight (out, in), bias (out,)
        "fc_w": jax.random.uniform(k1, (num_feature, num_feature), jnp.float32, -bound, bound),
        "fc_b": jax.random.uniform(k2, (num_feature,), jnp.float32, -bound, bound),
        # nn.LayerNorm(num_feature)
        "ln_g": jnp.ones((num_feature,), jnp.float32),
        "ln_b": jnp.zeros((num_feature,), jnp.float32),
        # nn.ConvTranspose1d(1, 1, kernel_size=2, stride=2): weight (1,1,2), bias (1,)
        "conv_w": jax.random.uniform(k3, (1, 1, 2), jnp.float32, -INV_SQRT2, INV_SQRT2),
        "conv_b": jax.random.uniform(k4, (1,), jnp.float32, -INV_SQRT2, INV_SQRT2),
    }


if __name__ == "__main__":
    key = jax.random.PRNGKey(0)
    kx, kx2, kp = jax.random.split(key, 3)

    # small shapes consistent with the module: batch=1 (required by the reference
    # transconv), seq_len=8, num_feature=32
    B, L, F = 1, 8, 32
    x = jax.random.normal(kx, (B, L, F), jnp.float32)
    params = init_params(kp, F)

    out = jax.block_until_ready(dwtnet_forward(x, params))
    ref = ref_forward(x, params)
    assert out.shape == (B, L, F)
    assert jnp.allclose(out, ref, atol=1e-4, rtol=1e-4), "Pallas kernel mismatch vs JAX reference"

    # second run exercising the multi-step grid + ragged last block (L2 % TM != 0)
    L_big = 2000
    x_big = jax.random.normal(kx2, (1, L_big, F), jnp.float32)
    out_big = jax.block_until_ready(dwtnet_forward(x_big, params))
    ref_big = ref_forward(x_big, params)
    assert jnp.allclose(out_big, ref_big, atol=1e-4, rtol=1e-4), "Pallas kernel mismatch (gridded path)"

    print("KERNEL_OK")
</pallas_src>

<mosaic_0001>
module attributes {stable_mosaic.version = 11 : i64} {
  func.func @dwtnet_kernel(%arg0: i32, %arg1: memref<6x64xf32, #tpu.memory_space<vmem>>, %arg2: memref<4x64xf32, #tpu.memory_space<vmem>>, %arg3: memref<32x32xf32, #tpu.memory_space<vmem>>, %arg4: memref<32x64xf32, #tpu.memory_space<vmem>>, %arg5: memref<4x64xf32, #tpu.memory_space<vmem>>) attributes {dimension_semantics = [#tpu.dimension_semantics<parallel>], iteration_bounds = array<i64: 1>, scalar_prefetch = 0 : i64, scratch_operands = 0 : i64, tpu.core_type = #tpu.core_type<tc>, window_params = [{pipeline_mode = #tpu.pipeline_mode<synchronous>, transform_indices = @transform_0, window_bounds = array<i64: 6, 64>}, {transform_indices = @transform_1, window_bounds = array<i64: 4, 64>}, {pipeline_mode = #tpu.pipeline_mode<synchronous>, transform_indices = @transform_2, window_bounds = array<i64: 32, 32>}, {pipeline_mode = #tpu.pipeline_mode<synchronous>, transform_indices = @transform_3, window_bounds = array<i64: 32, 64>}, {transform_indices = @transform_4, window_bounds = array<i64: 4, 64>}]} {
    %c0 = arith.constant 0 : index
    %c0_0 = arith.constant 0 : index
    %0 = vector.load %arg2[%c0, %c0_0] : memref<4x64xf32, #tpu.memory_space<vmem>>, vector<4x32xf32>
    %c0_1 = arith.constant 0 : index
    %c32 = arith.constant 32 : index
    %1 = vector.load %arg2[%c0_1, %c32] : memref<4x64xf32, #tpu.memory_space<vmem>>, vector<4x32xf32>
    %2 = arith.addf %0, %1 : vector<4x32xf32>
    %cst = arith.constant 0.707106769 : f32
    %3 = vector.broadcast %cst : f32 to vector<4x32xf32>
    %4 = arith.mulf %2, %3 : vector<4x32xf32>
    %5 = arith.subf %0, %1 : vector<4x32xf32>
    %cst_2 = arith.constant 0.707106769 : f32
    %6 = vector.broadcast %cst_2 : f32 to vector<4x32xf32>
    %7 = arith.mulf %5, %6 : vector<4x32xf32>
    %c0_3 = arith.constant 0 : index
    %c0_4 = arith.constant 0 : index
    %8 = vector.load %arg3[%c0_3, %c0_4] : memref<32x32xf32, #tpu.memory_space<vmem>>, vector<32x32xf32>
    %cst_5 = arith.constant dense<0.000000e+00> : vector<4x32xf32>
    %9 = tpu.matmul %4, %8, %cst_5 {dimension_numbers = #tpu.dot_dimension_numbers<[1], [0], [0], [1], [0, 0, 1, 1], [], []>} : vector<4x32xf32>, vector<32x32xf32>, vector<4x32xf32> -> vector<4x32xf32>
    %c0_6 = arith.constant 0 : index
    %c0_7 = arith.constant 0 : index
    %10 = vector.load %arg1[%c0_6, %c0_7] : memref<6x64xf32, #tpu.memory_space<vmem>>, vector<1x32xf32>
    %11 = vector.broadcast %10 : vector<1x32xf32> to vector<4x32xf32>
    %12 = arith.addf %9, %11 : vector<4x32xf32>
    %cst_8 = arith.constant 5.000000e-01 : f32
    %13 = vector.broadcast %cst_8 : f32 to vector<4x32xf32>
    %14 = arith.mulf %13, %12 : vector<4x32xf32>
    %cst_9 = arith.constant 0.707106769 : f32
    %15 = vector.broadcast %cst_9 : f32 to vector<4x32xf32>
    %16 = arith.mulf %12, %15 : vector<4x32xf32>
    %17 = math.erf %16 : vector<4x32xf32>
    %cst_10 = arith.constant 1.000000e+00 : f32
    %18 = vector.broadcast %cst_10 : f32 to vector<4x32xf32>
    %19 = arith.addf %18, %17 : vector<4x32xf32>
    %20 = arith.mulf %14, %19 : vector<4x32xf32>
    %21 = arith.addf %20, %7 : vector<4x32xf32>
    %cst_11 = arith.constant dense<0.000000e+00> : vector<4xf32>
    %22 = vector.multi_reduction <add>, %21, %cst_11 [1] : vector<4x32xf32> to vector<4xf32>
    %23 = vector.shape_cast %22 : vector<4xf32> to vector<4x1xf32>
    %cst_12 = arith.constant 3.200000e+01 : f32
    %24 = vector.broadcast %cst_12 : f32 to vector<4x1xf32>
    %25 = arith.divf %23, %24 : vector<4x1xf32>
    %26 = vector.broadcast %25 : vector<4x1xf32> to vector<4x32xf32>
    %27 = arith.subf %21, %26 : vector<4x32xf32>
    %28 = arith.mulf %27, %27 : vector<4x32xf32>
    %cst_13 = arith.constant dense<0.000000e+00> : vector<4xf32>
    %29 = vector.multi_reduction <add>, %28, %cst_13 [1] : vector<4x32xf32> to vector<4xf32>
    %30 = vector.shape_cast %29 : vector<4xf32> to vector<4x1xf32>
    %cst_14 = arith.constant 3.200000e+01 : f32
    %31 = vector.broadcast %cst_14 : f32 to vector<4x1xf32>
    %32 = arith.divf %30, %31 : vector<4x1xf32>
    %c2 = arith.constant 2 : index
    %c0_15 = arith.constant 0 : index
    %33 = vector.load %arg1[%c2, %c0_15] : memref<6x64xf32, #tpu.memory_space<vmem>>, vector<1x32xf32>
    %cst_16 = arith.constant 9.99999974E-6 : f32
    %34 = vector.broadcast %cst_16 : f32 to vector<4x1xf32>
    %35 = arith.addf %32, %34 : vector<4x1xf32>
    %36 = math.rsqrt %35 : vector<4x1xf32>
    %37 = vector.broadcast %33 : vector<1x32xf32> to vector<4x32xf32>
    %38 = vector.broadcast %36 : vector<4x1xf32> to vector<4x32xf32>
    %39 = arith.mulf %37, %38 : vector<4x32xf32>
    %40 = arith.mulf %27, %39 : vector<4x32xf32>
    %c3 = arith.constant 3 : index
    %c0_17 = arith.constant 0 : index
    %41 = vector.load %arg1[%c3, %c0_17] : memref<6x64xf32, #tpu.memory_space<vmem>>, vector<1x32xf32>
    %42 = vector.broadcast %41 : vector<1x32xf32> to vector<4x32xf32>
    %43 = arith.addf %40, %42 : vector<4x32xf32>
    %c0_18 = arith.constant 0 : index
    %c0_19 = arith.constant 0 : index
    %44 = vector.load %arg4[%c0_18, %c0_19] : memref<32x64xf32, #tpu.memory_space<vmem>>, vector<32x64xf32>
    %cst_20 = arith.constant dense<0.000000e+00> : vector<4x64xf32>
    %45 = tpu.matmul %43, %44, %cst_20 {dimension_numbers = #tpu.dot_dimension_numbers<[1], [0], [0], [1], [0, 0, 1, 1], [], []>} : vector<4x32xf32>, vector<32x64xf32>, vector<4x64xf32> -> vector<4x64xf32>
    %c1 = arith.constant 1 : index
    %c0_21 = arith.constant 0 : index
    %46 = vector.load %arg1[%c1, %c0_21] : memref<6x64xf32, #tpu.memory_space<vmem>>, vector<1x64xf32>
    %47 = vector.broadcast %46 : vector<1x64xf32> to vector<4x64xf32>
    %48 = arith.addf %45, %47 : vector<4x64xf32>
    %cst_22 = arith.constant 5.000000e-01 : f32
    %49 = vector.broadcast %cst_22 : f32 to vector<4x64xf32>
    %50 = arith.mulf %49, %48 : vector<4x64xf32>
    %cst_23 = arith.constant 0.707106769 : f32
    %51 = vector.broadcast %cst_23 : f32 to vector<4x64xf32>
    %52 = arith.mulf %48, %51 : vector<4x64xf32>
    %53 = math.erf %52 : vector<4x64xf32>
    %cst_24 = arith.constant 1.000000e+00 : f32
    %54 = vector.broadcast %cst_24 : f32 to vector<4x64xf32>
    %55 = arith.addf %54, %53 : vector<4x64xf32>
    %56 = arith.mulf %50, %55 : vector<4x64xf32>
    %c0_25 = arith.constant 0 : index
    %c0_26 = arith.constant 0 : index
    %57 = vector.load %arg5[%c0_25, %c0_26] : memref<4x64xf32, #tpu.memory_space<vmem>>, vector<4x64xf32>
    tpu.vector_store %arg5[%c0_25, %c0_26], %56 {strides = array<i32>} : memref<4x64xf32, #tpu.memory_space<vmem>>, vector<4x64xf32>,
    return
  }
  func.func @transform_0(%arg0: i32) -> (i32, i32) {
    %c0_i32 = arith.constant 0 : i32
    %c0_i32_0 = arith.constant 0 : i32
    %c0_i32_1 = arith.constant 0 : i32
    return %c0_i32, %c0_i32_0 : i32, i32
  }
  func.func @transform_1(%arg0: i32) -> (i32, i32) {
    %c0_i32 = arith.constant 0 : i32
    %c0_i32_0 = arith.constant 0 : i32
    return %arg0, %c0_i32 : i32, i32
  }
  func.func @transform_2(%arg0: i32) -> (i32, i32) {
    %c0_i32 = arith.constant 0 : i32
    %c0_i32_0 = arith.constant 0 : i32
    %c0_i32_1 = arith.constant 0 : i32
    return %c0_i32, %c0_i32_0 : i32, i32
  }
  func.func @transform_3(%arg0: i32) -> (i32, i32) {
    %c0_i32 = arith.constant 0 : i32
    %c0_i32_0 = arith.constant 0 : i32
    %c0_i32_1 = arith.constant 0 : i32
    return %c0_i32, %c0_i32_0 : i32, i32
  }
  func.func @transform_4(%arg0: i32) -> (i32, i32) {
    %c0_i32 = arith.constant 0 : i32
    %c0_i32_0 = arith.constant 0 : i32
    return %arg0, %c0_i32 : i32, i32
  }
}

</mosaic_0001>

<bundles_post_ra>
// kernel: squeeze.4
= control target key start
LH: loop header
LB: loop body
LE: loop exit
PB: predicated region body
PF: predicated region fallthrough
CT: control target
= control target key end

     0   :  { %vm3_vm0 = vcmask 261120   ;;  %s19_s8 = smov 32   ;;  %vm9_vm1 = vcmask 523520   ;;  %s39_s0 = inlined_call_operand.vmem [shape: f32[1,8,32], index: 0, kind: input, shape index: {}]   ;;  %s40_s1 = inlined_call_operand.vmem [shape: f32[4,64], index: 1, kind: output, shape index: {}]  }
   0x1   :  { %v17_v0 = vld [vmem:[%s39_s0 + $0x1] ss:$2 sm:$0xf]   ;;  %v2_v1 = vld [vmem:[%s39_s0] ss:$2 sm:$0xf]  }
   0x2   :  { %7 = vrot.lane.b32.xlu0 %v17_v0, %s19_s8  ;;  %4 = vst.msk [vmem:[#allocation0] sm:$0xf] %vm3_vm0, %v2_v1  }
  0x74   :  { %v8_v2 = vpop.permute.xlu0 %7  }
  0x75   :  { %10 = vst.msk [vmem:[#allocation0] sm:$0xf] %vm9_vm1, %v8_v2  }
  0x7c   :  { %v14_v3 = vld [vmem:[#allocation0] sm:$0xf] }
  0x7d   :  { %16 = vst [vmem:[%s40_s1] sm:$0xf] %v14_v3 }

// kernel: dwtnet_forward.1
= control target key start
LH: loop header
LB: loop body
LE: loop exit
PB: predicated region body
PF: predicated region fallthrough
CT: control target
= control target key end

     0   :  { %v295_v1 = vmov 0.0|0.0   ;;  %vm296_vm0 = vmmov 0   ;;  %v297_v4 = vmov 0.0   ;;  %s298_s21 = smov 96   ;;  %vm35_vm1 = vcmask 261120   ;;  %s368_s1 = inlined_call_operand.vmem [shape: f32[4,64], index: 1, kind: input, shape index: {}]   ;;  %s369_s2 = inlined_call_operand.vmem [shape: f32[32,32], index: 2, kind: input, shape index: {}]   ;;  %s370_s0 = inlined_call_operand.vmem [shape: f32[6,64], index: 0, kind: input, shape index: {}]   ;;  %s371_s3 = inlined_call_operand.vmem [shape: f32[32,64], index: 3, kind: input, shape index: {}]   ;;  %s372_s4 = inlined_call_operand.vmem [shape: f32[4,64], index: 4, kind: output, shape index: {}]  }
   0x1   :  { %v17_v0 = vld [vmem:[%s368_s1] sm:$0xf]  ;;  %273 = vmatprep.subr.bf16.mxu0 %v295_v1  ;;  %v27_v3 = vld [vmem:[%s369_s2 + $0x8] sm:$0xff]  ;;  %259 = vmatprep.mubr.msk.f32.mxu0 %vm296_vm0, %v297_v4  ;;  %v28_v6 = vld [vmem:[%s369_s2 + $0x10] sm:$0xff]  ;;  %vm115_vm2 = vcmask 257024   ;;  %vm229_vm3 = vcmask 519168  }
   0x2   :  { %v26_v2 = vld [vmem:[%s369_s2] sm:$0xff]  ;;  %19 = vrot.lane.b32.xlu0 %v17_v0, %s298_s21  ;;  %v29_v7 = vld [vmem:[%s369_s2 + $0x18] sm:$0xff]  ;;  %279 = vmatprep.subr.bf16.mxu1 %v295_v1  ;;  %v143_v31 = vld [vmem:[%s371_s3 + $0x8] sm:$0xff] }
   0x3   :  { %v274_v5 = vpack.c.bf16 %v27_v3, %v26_v2  ;;  %270 = vmatprep.mubr.msk.f32.mxu1 %vm296_vm0, %v297_v4  ;;  %v277_v8 = vpack.c.bf16 %v29_v7, %v28_v6  ;;  %v235_v12 = vld [vmem:[%s370_s0] ss:$0 sm:$0xff]  ;;  %v144_v32 = vld [vmem:[%s371_s3 + $0x10] sm:$0xff]  ;;  %v145_v34 = vld [vmem:[%s371_s3 + $0x18] sm:$0xff] }
   0x4   :  { %v142_v30 = vld [vmem:[%s371_s3] sm:$0xff]  ;;  %v283_v35 = vpack.c.bf16 %v145_v34, %v144_v32 }
   0x5   :  { %275 = vmatpush3.bf16.msra.mxu0 %v274_v5  ;;  %v280_v33 = vpack.c.bf16 %v143_v31, %v142_v30  ;;  %v237_v39 = vld [vmem:[%s370_s0 + $0x2] ss:$0 sm:$0xff]  ;;  %v238_v42 = vld [vmem:[%s370_s0 + $0x3] ss:$0 sm:$0xff]  ;;  %v239_v45 = vld [vmem:[%s370_s0 + $0x1] ss:$0 sm:$0xff] }
   0x6   :  { %276 = vmatprep.subr.bf16.mxu0 %v295_v1 }
   0x7   :  { %281 = vmatpush3.bf16.msra.mxu1 %v280_v33 }
   0x8   :  { %282 = vmatprep.subr.bf16.mxu1 %v295_v1 }
   0x9   :  { %278 = vmatpush3.bf16.msra.mxu0 %v277_v8 }
   0xb   :  { %284 = vmatpush3.bf16.msra.mxu1 %v283_v35 }
  0x74   :  { %v20_v9 = vpop.permute.xlu0 %19 }
  0x75   :  { %v22_v10 = vadd.f32 %v20_v9, %v17_v0  ;;  %v24_v17 = vsub.f32 %v17_v0, %v20_v9 }
  0x77   :  { %v23_v11 = vmul.f32 0.70710677, %v22_v10  ;;  %v25_v21 = vmul.f32 0.70710677, %v24_v17 }
  0x79   :  { %260 = vmatmul.mubr.msk.f32.vlgmr.msra.gmra.mrb[0].mxu0 %vm35_vm1, %v23_v11 }
 0x14c   :  { %v105_v13 = vpop.f32.mrb[0].mxu0 }
 0x14d   :  { %v106_v14 = vadd.f32 %v235_v12, %v105_v13  ;;  %v261_v15 = vpop.f32.mrb[1].mxu0 }
 0x14f   :  { %v110_v16 = vmul.f32 0.70710677, %v106_v14  ;;  %v109_v19 = vmul.f32 0.5, %v106_v14 }
 0x151   :  { %289 = verf.f32 %v110_v16 }
 0x15b   :  { %v290_v18 = vpop.eup %289 }
 0x15c   :  { %v112_v20 = vadd.f32 1.0, %v290_v18 }
 0x15e   :  { %v113_v22 = vmul.f32 %v112_v20, %v109_v19 }
 0x160   :  { %v114_v23 = vadd.f32 %v113_v22, %v25_v21 }
 0x162   :  { %v116_v24 = vsel %vm115_vm2, %v114_v23, 0.0 }
 0x163   :  { %117 = vadd.xlane.f32.xlu0 %v116_v24 }
 0x1f0   :  { %v118_v25 = vpop.xlane.xlu0 %117 }
 0x1f1   :  { %v120_v26 = vmul.f32 0.03125, %v118_v25 }
 0x1f3   :  { %v121_v27 = vsub.f32 %v114_v23, %v120_v26 }
 0x1f5   :  { %v122_v28 = vmul.f32 %v121_v27, %v121_v27 }
 0x1f7   :  { %v123_v29 = vsel %vm115_vm2, %v122_v28, 0.0 }
 0x1f8   :  { %124 = vadd.xlane.f32.xlu1 %v123_v29 }
 0x285   :  { %v125_v36 = vpop.xlane.xlu1 %124 }
 0x286   :  { %v126_v37 = vmul.f32 0.03125, %v125_v36 }
 0x288   :  { %v128_v38 = vadd.f32 1e-05, %v126_v37 }
 0x28a   :  { %291 = vrsqrt.f32 %v128_v38 }
 0x294   :  { %v292_v40 = vpop.eup %291 }
 0x295   :  { %v134_v41 = vmul.f32 %v292_v40, %v237_v39 }
 0x297   :  { %v135_v43 = vmul.f32 %v134_v41, %v121_v27 }
 0x299   :  { %v141_v44 = vadd.f32 %v238_v42, %v135_v43 }
 0x29b   :  { %271 = vmatmul.mubr.msk.f32.vlgmr.msra.gmra.mrb[0].mxu1 %vm35_vm1, %v141_v44 }
 0x36e   :  { %v220_v46 = vpop.f32.mrb[0].mxu1 }
 0x36f   :  { %v221_v47 = vadd.f32 %v239_v45, %v220_v46  ;;  %v272_v48 = vpop.f32.mrb[1].mxu1 }
 0x371   :  { %v225_v49 = vmul.f32 0.70710677, %v221_v47  ;;  %v224_v51 = vmul.f32 0.5, %v221_v47 }
 0x373   :  { %293 = verf.f32 %v225_v49 }
 0x37d   :  { %v294_v50 = vpop.eup %293 }
 0x37e   :  { %v227_v52 = vadd.f32 1.0, %v294_v50 }
 0x380   :  { %v228_v53 = vmul.f32 %v227_v52, %v224_v51 }
 0x382   :  { %230 = vst.msk [vmem:[%s372_s4] sm:$0xf] %vm229_vm3, %v228_v53 }

</bundles_post_ra>
